<compile_context>
chip_gen: v7x
topology: tpu7x:2x2x1
jax: 0.10.0
libtpu: 0.0.40
codegen_flags: <defaults>
</compile_context>

<pallas_src>
import math

import numpy as np

import jax
import jax.numpy as jnp
from jax.experimental import pallas as pl
from jax.experimental.pallas import tpu as pltpu


def _round_up(a: int, b: int) -> int:
    return (a + b - 1) // b * b


def _pick_group(c: int, levels: int) -> int:
    """Rows packed per kernel row so the cos/sin width is lane-dense."""
    cl = c * levels
    g = 128 // math.gcd(cl, 128)        # smallest g with (g * cl) % 128 == 0
    if g * cl > 1024:                   # keep packed width modest for odd C*L
        g = max(1, -(-128 // cl))
    return g


def _fourier_kernel(x_ref, sel_ref, fp_ref, out_ref):
    # x_ref  : (block_m, G*C)      packed input rows (G original rows each)
    # sel_ref: (G*C, W)  bf16      0/1 block-diagonal channel-selection matrix
    # fp_ref : (2, W)    f32       row 0 = frequency per output column,
    #                              row 1 = phase (0 for cos cols, -pi/2 for sin cols)
    # out_ref: (block_m, W)        W = G * 2 * C * L, per-row [cos | sin] interleaved
    x = x_ref[...].astype(jnp.float32)

    # Split x into three bf16 limbs so the MXU channel-expansion is f32-accurate
    # regardless of matmul pass selection (sel is exactly representable in bf16,
    # so each limb's dot is exact; hi+mid+lo reconstructs x to ~f32 precision).
    x_hi = x.astype(jnp.bfloat16)
    r1 = x - x_hi.astype(jnp.float32)
    x_mid = r1.astype(jnp.bfloat16)
    x_lo = (r1 - x_mid.astype(jnp.float32)).astype(jnp.bfloat16)

    sel = sel_ref[...]
    rep = jnp.dot(x_hi, sel, preferred_element_type=jnp.float32)
    rep += jnp.dot(x_mid, sel, preferred_element_type=jnp.float32)
    rep += jnp.dot(x_lo, sel, preferred_element_type=jnp.float32)
    # rep[:, j] == x[:, src(j)] (channel gather on the MXU; VALU/XLU stay free).

    # args = x_expanded * freq; sin(a) emitted as cos(a - pi/2) so one
    # full-lane-width cos covers the whole interleaved [cos|sin] slab.
    args = rep * fp_ref[0:1, :] + fp_ref[1:2, :]
    out_ref[...] = jnp.cos(args).astype(out_ref.dtype)   # single wide unmasked store


def fourier_features(x, levels: int, scale: float = 2.0 * math.pi, block_m=None):
    """Pallas TPU implementation of FourierFeatures.forward for x of shape [N, C]."""
    assert x.ndim == 2, "FourierFeatures expects x of shape [N, C]"
    assert levels >= 1
    n, c = x.shape
    cl = c * levels
    out_dtype = x.dtype

    # ---- group packing (lane-dense args/output; free reshape back) ----
    g = _pick_group(c, levels)
    gc = g * c                       # packed input width
    w_cols = 2 * g * cl              # packed output width (per-row interleave kept)

    n_pad = _round_up(n, g)
    m_rows = n_pad // g
    xp = x if n_pad == n else jnp.concatenate(
        [x, jnp.zeros((n_pad - n, c), x.dtype)], axis=0)
    xg = xp.reshape(m_rows, gc)      # contiguous (free) reshape

    # ---- trace-time constants, built in numpy (kept off the traced graph) ----
    j = np.arange(w_cols)
    grp = j // (2 * cl)              # which row-of-the-group this column belongs to
    off = j % (2 * cl)
    trig = off // cl                 # 0 -> cos column, 1 -> sin column
    pos = off % cl
    chan = pos // levels
    lvl = pos % levels
    sel_np = np.zeros((gc, w_cols), np.float32)
    sel_np[grp * c + chan, j] = 1.0                       # exact 0/1 -> exact in bf16
    freq = (scale * (2.0 ** lvl)).astype(np.float32)      # == reference f32 table
    phase = np.where(trig == 1, -np.pi / 2.0, 0.0).astype(np.float32)
    sel = jnp.asarray(sel_np, dtype=jnp.bfloat16)
    fp = jnp.asarray(np.stack([freq, phase], axis=0))     # (2, W) float32

    # ---- block sizing: (8,128)-pad-aware VMEM accounting + >= ~8 grid steps ----
    lanes_in = _round_up(gc, 128)
    lanes_out = _round_up(w_cols, 128)
    if block_m is None:
        bytes_per_row = 4 * (lanes_in + lanes_out)        # f32-equivalent, lane-padded
        bm = (8 * 1024 * 1024) // (2 * bytes_per_row)     # ~8 MiB working-set target
        bm = max(8, min(int(bm), 1024))
        # Keep >= ~8 grid steps so v7x megacore sharding + pipelining have work.
        bm = min(bm, max(8, _round_up(pl.cdiv(m_rows, 8), 8)))
        block_m = _round_up(bm, 8)
    if block_m >= m_rows:
        block_m = m_rows                                  # full-extent block is allowed

    # Scoped-VMEM request sized to actual need (double-buffered blocks + f32
    # intermediates + resident constants); a few MiB, always < v7x's 64 MiB.
    vmem_need = (2 * block_m * (lanes_in + lanes_out) * 4
                 + 4 * block_m * lanes_out * 4
                 + 2 * _round_up(gc, 16) * lanes_out * 2
                 + 2 * 8 * lanes_out * 4)
    vmem_limit = int(min(64 * 1024 * 1024, max(8 * 1024 * 1024, 2 * vmem_need)))

    itemsize = jnp.dtype(out_dtype).itemsize
    cost = pl.CostEstimate(
        flops=2 * 3 * m_rows * gc * w_cols,               # three bf16 expansion matmuls
        transcendentals=m_rows * w_cols,                  # one cos per output element
        bytes_accessed=int((n * c + 2 * n * cl) * itemsize
                           + sel.size * 2 + fp.size * 4),
    )

    grid = (pl.cdiv(m_rows, block_m),)
    out_packed = pl.pallas_call(
        _fourier_kernel,
        out_shape=jax.ShapeDtypeStruct((m_rows, w_cols), out_dtype),
        grid=grid,
        in_specs=[
            pl.BlockSpec((block_m, gc), lambda i: (i, 0)),
            pl.BlockSpec((gc, w_cols), lambda i: (0, 0)),   # VMEM-resident constant
            pl.BlockSpec((2, w_cols), lambda i: (0, 0)),    # VMEM-resident constant
        ],
        out_specs=pl.BlockSpec((block_m, w_cols), lambda i: (i, 0)),
        compiler_params=pltpu.CompilerParams(
            dimension_semantics=("parallel",),
            vmem_limit_bytes=vmem_limit),
        cost_estimate=cost,
    )(xg, sel, fp)

    # Free contiguous reshape back to the reference layout [N, 2*C*L].
    out = out_packed.reshape(n_pad, 2 * cl)
    return out if n_pad == n else out[:n]


def _reference(x, levels: int, scale: float = 2.0 * math.pi):
    # Pure-JAX reproduction of the PyTorch forward (f32 math) for verification.
    freqs = scale * (2.0 ** jnp.arange(levels, dtype=jnp.float32))   # [L]
    scale_full = jnp.tile(freqs, x.shape[1])                         # [C*L]
    args = jnp.repeat(x.astype(jnp.float32), levels, axis=1) * scale_full
    out = jnp.concatenate([jnp.cos(args), jnp.sin(args)], axis=1)
    return out.astype(x.dtype)


if __name__ == "__main__":
    LEVELS = 4
    SCALE = 2.0 * math.pi

    key = jax.random.PRNGKey(0)
    N, C = 256, 4
    x = jax.random.uniform(key, (N, C), dtype=jnp.float32, minval=-0.5, maxval=0.5)

    out = jax.block_until_ready(fourier_features(x, LEVELS, SCALE))
    ref = _reference(x, LEVELS, SCALE)
    assert out.shape == (N, 2 * C * LEVELS), out.shape
    assert jnp.allclose(out, ref, atol=5e-5, rtol=5e-5), "mismatch vs reference"

    # Ragged N (not a multiple of the row-group packing) + partial grid tile.
    out2 = jax.block_until_ready(fourier_features(x[:100], LEVELS, SCALE, block_m=8))
    assert jnp.allclose(out2, ref[:100], atol=5e-5, rtol=5e-5), "partial-tile mismatch"

    print("KERNEL_OK")
</pallas_src>

<mosaic_0001>
module attributes {stable_mosaic.version = 11 : i64} {
  func.func @_fourier_kernel(%arg0: i32, %arg1: memref<8x32xf32, #tpu.memory_space<vmem>>, %arg2: memref<32x256xbf16, #tpu.memory_space<vmem>>, %arg3: memref<2x256xf32, #tpu.memory_space<vmem>>, %arg4: memref<8x256xf32, #tpu.memory_space<vmem>>) attributes {dimension_semantics = [#tpu.dimension_semantics<parallel>], iteration_bounds = array<i64: 4>, scalar_prefetch = 0 : i64, scratch_operands = 0 : i64, tpu.core_type = #tpu.core_type<tc>, window_params = [{transform_indices = @transform_0, window_bounds = array<i64: 8, 32>}, {pipeline_mode = #tpu.pipeline_mode<synchronous>, transform_indices = @transform_1, window_bounds = array<i64: 32, 256>}, {pipeline_mode = #tpu.pipeline_mode<synchronous>, transform_indices = @transform_2, window_bounds = array<i64: 2, 256>}, {transform_indices = @transform_3, window_bounds = array<i64: 8, 256>}]} {
    %c0 = arith.constant 0 : index
    %c0_0 = arith.constant 0 : index
    %0 = vector.load %arg1[%c0, %c0_0] : memref<8x32xf32, #tpu.memory_space<vmem>>, vector<8x32xf32>
    %1 = arith.truncf %0 : vector<8x32xf32> to vector<8x32xbf16>
    %2 = arith.extf %1 : vector<8x32xbf16> to vector<8x32xf32>
    %3 = arith.subf %0, %2 : vector<8x32xf32>
    %4 = arith.truncf %3 : vector<8x32xf32> to vector<8x32xbf16>
    %5 = arith.extf %4 : vector<8x32xbf16> to vector<8x32xf32>
    %6 = arith.subf %3, %5 : vector<8x32xf32>
    %7 = arith.truncf %6 : vector<8x32xf32> to vector<8x32xbf16>
    %c0_1 = arith.constant 0 : index
    %c0_2 = arith.constant 0 : index
    %8 = vector.load %arg2[%c0_1, %c0_2] : memref<32x256xbf16, #tpu.memory_space<vmem>>, vector<32x256xbf16>
    %cst = arith.constant dense<0.000000e+00> : vector<8x256xf32>
    %9 = tpu.matmul %1, %8, %cst {dimension_numbers = #tpu.dot_dimension_numbers<[1], [0], [0], [1], [0, 0, 1, 1], [], []>} : vector<8x32xbf16>, vector<32x256xbf16>, vector<8x256xf32> -> vector<8x256xf32>
    %cst_3 = arith.constant dense<0.000000e+00> : vector<8x256xf32>
    %10 = tpu.matmul %4, %8, %cst_3 {dimension_numbers = #tpu.dot_dimension_numbers<[1], [0], [0], [1], [0, 0, 1, 1], [], []>} : vector<8x32xbf16>, vector<32x256xbf16>, vector<8x256xf32> -> vector<8x256xf32>
    %11 = arith.addf %9, %10 : vector<8x256xf32>
    %cst_4 = arith.constant dense<0.000000e+00> : vector<8x256xf32>
    %12 = tpu.matmul %7, %8, %cst_4 {dimension_numbers = #tpu.dot_dimension_numbers<[1], [0], [0], [1], [0, 0, 1, 1], [], []>} : vector<8x32xbf16>, vector<32x256xbf16>, vector<8x256xf32> -> vector<8x256xf32>
    %13 = arith.addf %11, %12 : vector<8x256xf32>
    %c0_5 = arith.constant 0 : index
    %c0_6 = arith.constant 0 : index
    %14 = vector.load %arg3[%c0_5, %c0_6] : memref<2x256xf32, #tpu.memory_space<vmem>>, vector<1x256xf32>
    %15 = vector.broadcast %14 : vector<1x256xf32> to vector<8x256xf32>
    %16 = arith.mulf %13, %15 : vector<8x256xf32>
    %c1 = arith.constant 1 : index
    %c0_7 = arith.constant 0 : index
    %17 = vector.load %arg3[%c1, %c0_7] : memref<2x256xf32, #tpu.memory_space<vmem>>, vector<1x256xf32>
    %18 = vector.broadcast %17 : vector<1x256xf32> to vector<8x256xf32>
    %19 = arith.addf %16, %18 : vector<8x256xf32>
    %20 = math.cos %19 : vector<8x256xf32>
    %c0_8 = arith.constant 0 : index
    %c0_9 = arith.constant 0 : index
    %21 = vector.load %arg4[%c0_8, %c0_9] : memref<8x256xf32, #tpu.memory_space<vmem>>, vector<8x256xf32>
    tpu.vector_store %arg4[%c0_8, %c0_9], %20 {strides = array<i32>} : memref<8x256xf32, #tpu.memory_space<vmem>>, vector<8x256xf32>,
    return
  }
  func.func @transform_0(%arg0: i32) -> (i32, i32) {
    %c0_i32 = arith.constant 0 : i32
    %c0_i32_0 = arith.constant 0 : i32
    return %arg0, %c0_i32 : i32, i32
  }
  func.func @transform_1(%arg0: i32) -> (i32, i32) {
    %c0_i32 = arith.constant 0 : i32
    %c0_i32_0 = arith.constant 0 : i32
    %c0_i32_1 = arith.constant 0 : i32
    return %c0_i32, %c0_i32_0 : i32, i32
  }
  func.func @transform_2(%arg0: i32) -> (i32, i32) {
    %c0_i32 = arith.constant 0 : i32
    %c0_i32_0 = arith.constant 0 : i32
    %c0_i32_1 = arith.constant 0 : i32
    return %c0_i32, %c0_i32_0 : i32, i32
  }
  func.func @transform_3(%arg0: i32) -> (i32, i32) {
    %c0_i32 = arith.constant 0 : i32
    %c0_i32_0 = arith.constant 0 : i32
    return %arg0, %c0_i32 : i32, i32
  }
}

</mosaic_0001>

<bundles_post_ra>
// kernel: tpu_custom_call.1
= control target key start
LH: loop header
LB: loop body
LE: loop exit
PB: predicated region body
PF: predicated region fallthrough
CT: control target
= control target key end

     0   :  { %8 = vsyncpa [#allocation3], 0  ;;  %s1261_s0 = inlined_call_operand.hbm [shape: f32[32,32], index: 0, kind: input, shape index: {}]   ;;  %s1262_s1 = inlined_call_operand.hbm [shape: bf16[32,256], index: 1, kind: input, shape index: {}]   ;;  %s1263_s2 = inlined_call_operand.vmem [shape: f32[2,256], index: 2, kind: input, shape index: {}]   ;;  %s1264_s3 = inlined_call_operand.hbm [shape: f32[32,256], index: 3, kind: output, shape index: {}]  }
   0x1   :  { %10 = vsyncpa [#allocation3 + $0x1], 0 }
   0x2   :  { %11 = vsyncpa [#allocation6], 0 }
   0x3   :  { %12 = vsyncpa [#allocation4], 0 }
   0x4   :  { %14 = vsyncpa [#allocation4 + $0x1], 0  ;;  %s989_s12 = smov 0   ;;  %s991_s13 = smov 0  }
   0x5   :  { %s993_s14 = smov 0   ;;  %s995_s15 = smov 0  }
   0x6 LB: > { %s1010_s16 = sadd.s32 4294967295, %s955_s15   ;;  %s701_s17 = sadd.s32 4294967294, %s955_s15   ;;  %s955_s15 = sphi %s995_s15, %s1287_s15   ;;  %s951_s14 = sphi %s993_s14, %s1286_s14   ;;  %s947_s13 = sphi %s991_s13, %s1285_s13   ;;  %s943_s12 = sphi %s989_s12, %s1284_s12  }
   0x7   : > { %p40_p0 = scmp.ne.s32.totalorder %s947_s13, %s943_s12  ;;  %p1265_p1 = scmp.eq.s32.totalorder %s1010_s16, 0 }
   0x8   : > { %p112_p3 = scmp.eq.s32.totalorder %s701_s17, 3  ;;  %p702_p5 = scmp.ge.s32.totalorder %s955_s15, 1 }
   0x9   : > { %p1019_p4 = por %p1265_p1, %p40_p0  ;;  %p119_p7 = scmp.lt.s32.totalorder %s955_s15, 5 }
   0xa   : > { %p1024_p6 = por %p112_p3, %p40_p0  ;;  %s957_s21 = smov [#allocation5]  }
   0xb   : > { %s1268_s18 = scalar_select %p1019_p4, 1, 0 }
   0xc   : > { %s1269_s19 = scalar_select %p1024_p6, 1, 0 }
   0xd   : > { %p1029_p8 = pnand %p702_p5, %p119_p7  ;;  %s131_s22 = sshll.u32 %s957_s21, 4  ;;  %s132_s22 = int_to_ptr.vmem [resolvable:$true] %s131_s22 }
   0xe   : > { %s1042_s24 = sadd.s32 1, %s955_s15   ;;  %s27_s25 = sadd.s32 1, %s951_s14 }
   0xf   : > { %s1270_s20 = scalar_select %p1029_p8, 1, 0 }
  0x10   : > { %p755_p9 = pneg %p1029_p8  ;;  %s24_s26 = ssub.s32 %s955_s15, %s1042_s24 }
  0x11   : > { %s827_s29 = scalar_lea.hbm %s1262_s1, 512 }
  0x12   : > { %p1037_p10 = pnand %p755_p9, %p1265_p1  ;;  %p828_p11 = scmp.ne.s32.totalorder %s1262_s1, %s827_s29 }
  0x13   : > { %p834_p3 = scmp.lt.u32.totalorder %s827_s29, %s1262_s1 }
  0x14   : > { %p829_p12 = pneg %p1037_p10 }
  0x16   : > { %p830_p13 = pnand %p829_p12, %p828_p11 }
  0x18   : > { %p831_p0 = pneg %p830_p13 }
  0x1a   : > { %p836_p5 = pnand %p834_p3, %p831_p0 }
  0x1c   : > { %839 = shalt.err (!%p836_p5)
}
  0x1d   : > { %s840_s7 = scalar_lea.vmem %s132_s22, 512  ;;  %p848_p2 = scmp.lt.s32.totalorder %s132_s22, %s132_s22 }
  0x1e   : > { %p841_p7 = scmp.ne.s32.totalorder %s132_s22, %s840_s7  ;;  %p849_p6 = scmp.lt.s32.totalorder %s840_s7, %s840_s7 }
  0x20   : > { %p843_p9 = pnand %p841_p7, %p829_p12  ;;  %p850_p4 = por %p849_p6, %p848_p2 }
  0x22   : > { %p844_p1 = pneg %p843_p9 }
  0x24   : > { %p851_p8 = pnand %p850_p4, %p844_p1 }
  0x26   : > { %854 = shalt.err (!%p851_p8)
}
  0x27   : > { %s958_s8 = smov 128   ;;  %s959_s9 = smov 8  }
  0x28   : > { %758 = dma.hbm_to_vmem [thread:$0]  (!%p1037_p10), %s1262_s1, 512, %s132_s22, [#allocation6], %s958_s8, %s958_s8, %s959_s9  }
  0x29   : > { %p25_p11 = scmp.eq.s32.totalorder %s24_s26, 0  ;;  %p34_p2 = scmp.ne.s32.totalorder %s951_s14, %s947_s13 }
  0x2a   : > { %p35_p1 = scmp.eq.s32.totalorder %s955_s15, 0  ;;  %p768_p4 = scmp.lt.s32.totalorder %s955_s15, 4 }
  0x2b   : > { %s1068_s17 = scalar_select %p25_p11, %s951_s14, %s27_s25  }
  0x2c   : > { %p36_p6 = por %p35_p1, %p34_p2  ;;  %p1272_p8 = scmp.eq.s32.totalorder %s1010_s16, 3 }
  0x2d   : > { %s148_s27 = sand.u32 1, %s951_s14   ;;  %s706_s28 = sshll.u32 %s955_s15, 7 }
  0x2e   : > { %p1072_p12 = por %p1272_p8, %p34_p2  ;;  %s705_s29 = sshll.u32 %s148_s27, 3 }
  0x2f   : > { %s1081_s4 = scalar_lea.hbm %s1261_s0, %s706_s28  ;;  %s152_s22 = scalar_lea.vmem [#allocation2], %s705_s29 }
  0x30   : > { %s159_s25 = sshll.u32 %s152_s22, 4  ;;  %p1083_p10 = pnand %p768_p4, %p36_p6  ;;  %s1087_s25 = int_to_ptr.vmem [resolvable:$true] %s159_s25 }
  0x31   : > { %s149_s5 = scalar_lea.sflag [#allocation3], %s148_s27  ;;  %s855_s6 = scalar_lea.hbm %s1081_s4, 128 }
  0x32   : > { %p856_p13 = scmp.ne.s32.totalorder %s1081_s4, %s855_s6  ;;  %p857_p0 = pneg %p1083_p10 }
  0x33   : > { %s860_s9 = scalar_lea.hbm %s1261_s0, 512  ;;  %p861_p7 = scmp.lt.u32.totalorder %s1081_s4, %s1261_s0 }
  0x34   : > { %p858_p3 = pnand %p857_p0, %p856_p13  ;;  %p862_p9 = scmp.lt.u32.totalorder %s860_s9, %s855_s6 }
  0x35   : > { %p864_p2 = scmp.lt.u32.totalorder %s855_s6, %s1081_s4 }
  0x36   : > { %p859_p5 = pneg %p858_p3  ;;  %p863_p11 = por %p862_p9, %p861_p7 }
  0x38   : > { %p865_p1 = por %p864_p2, %p863_p11 }
  0x3a   : > { %p866_p4 = pnand %p865_p1, %p859_p5 }
  0x3c   : > { %869 = shalt.err (!%p866_p4)
}
  0x3d   : > { %s870_s27 = scalar_lea.vmem %s1087_s25, 128  ;;  %s960_s28 = smov [#allocation2]  }
  0x3e   : > { %p871_p6 = scmp.ne.s32.totalorder %s1087_s25, %s870_s27  ;;  %s875_s29 = sshll.u32 %s960_s28, 4  ;;  %s876_s29 = int_to_ptr.vmem [resolvable:$false] %s875_s29 }
  0x3f   : > { %s877_s23 = scalar_lea.vmem %s876_s29, 256  ;;  %p878_p3 = scmp.lt.s32.totalorder %s1087_s25, %s876_s29 }
  0x40   : > { %p873_p8 = pnand %p871_p6, %p857_p0  ;;  %p879_p7 = scmp.lt.s32.totalorder %s877_s23, %s870_s27 }
  0x42   : > { %p874_p13 = pneg %p873_p8  ;;  %p880_p9 = por %p879_p7, %p878_p3 }
  0x44   : > { %p881_p11 = pnand %p880_p9, %p874_p13 }
  0x46   : > { %884 = shalt.err (!%p881_p11)
}
  0x47   : > { %762 = dma.hbm_to_vmem [thread:$0]  (!%p1083_p10), %s1081_s4, 128, %s1087_s25, %s149_s5  }
  0x48   : > { %p1275_p5 = scmp.ne.s32.totalorder %s1270_s20, 0 }
  0x49   : > { %s1117_s30 = sand.u32 (!%p1275_p5), 1, %s947_s13   ;;  %p1276_p0 = scmp.ne.s32.totalorder (!%p1275_p5), %s1268_s18, 0 }
  0x4a   : > { %168 = sbr.rel (%p1275_p5) target bundleno = 428 (0x1ac), region = 32  ;;  %s708_s22 = sshll.u32 (!%p1275_p5), %s1117_s30, 3 }
  0x4b   : > { %s171_s6 = scalar_lea.sflag (!%p1275_p5), [#allocation3], %s1117_s30  ;;  %s174_s7 = scalar_lea.vmem (!%p1275_p5), [#allocation2], %s708_s22 }
  0x51   : > { %930 = dma.done.wait (%p1276_p0), %s171_s6, 128  }
  0x52   : > { %932 = vsyncadd (%p1276_p0), %s171_s6, 4294967168  ;;  %p1277_p2 = scmp.eq.s32.totalorder %s1010_s16, 0 }
  0x54   : > { %934 = dma.done.wait (%p1277_p2), [#allocation6], 512   ;;  %p1278_p10 = pmov %p1277_p2 }
  0x55   : > { %v961_v0 = vmov 0   ;;  %v813_v1 = vld [vmem:[#allocation5 + $0x4] ss:$8 sps:$4 sm:$0xff]   ;;  %v815_v2 = vld [vmem:[#allocation5] ss:$8 sps:$4 sm:$0xff]   ;;  %v202_v4 = vld [vmem:[%s174_s7] sm:$0xff]  ;;  %v371_v13 = vlaneseq }
  0x56   : > { %936 = vsyncadd (%p1278_p10), [#allocation6], 4294966784  ;;  %314 = vmatprep.mubr.bf16.mxu0 %v961_v0  ;;  %270 = vmatprep.mubr.bf16.mxu1 %v961_v0  ;;  %v816_v3 = vld [vmem:[#allocation5 + $0x14] ss:$8 sps:$4 sm:$0xff]   ;;  %v818_v5 = vld [vmem:[#allocation5 + $0x10] ss:$8 sps:$4 sm:$0xff]   ;;  %v203_v6 = vpack.c.bf16 %v202_v4, %v202_v4 }
  0x57   : > { %282 = vmatprep.subr.bf16.mxu0 %v813_v1  ;;  %238 = vmatprep.subr.bf16.mxu1 %v813_v1  ;;  %vm234_vm0 = vcmask 261120   ;;  %v372_v17 = vshrl.u32 %v371_v13, 7  ;;  %v369_v20 = vld [vmem:[%s1263_s2] ss:$2 sm:$0x3]  ;;  %s710_s26 = sshll.u32 %s1117_s30, 4 }
  0x58   : > { %283 = vmatpush1.bf16.msra.mxu0 %v815_v2  ;;  %239 = vmatpush1.bf16.msra.mxu1 %v815_v2  ;;  %v204_v7 = vunpack.c.l.bf16 %v203_v6  ;;  %v718_v22 = vld [vmem:[%s1263_s2 + $0x1] ss:$2 sm:$0x3]  ;;  %v962_v57 = vmov 683565275   ;;  %s200_s5 = scalar_lea.vmem [#allocation7], %s710_s26 }
  0x59   : > { %284 = vmatprep.subr.bf16.mxu0 %v816_v3  ;;  %240 = vmatprep.subr.bf16.mxu1 %v816_v3  ;;  %v373_v19 = vsub.s32 0, %v372_v17  ;;  %v377_v21 = vsub.s32 1, %v372_v17  ;;  %v963_v61 = vmov 2475754826   ;;  %v964_v63 = vmov 2131351028  }
  0x5a   : > { %v205_v8 = vsub.f32 %v202_v4, %v204_v7  ;;  %s732_s8 = sshll.u32 %s1010_s16, 8  ;;  %s621_s9 = sshll.u32 %s200_s5, 4  ;;  %s1220_s9 = int_to_ptr.vmem [resolvable:$true] %s621_s9 }
  0x5b   : > { %v374_v23 = vrot.slane %v369_v20, %v373_v19  ;;  %v378_v25 = vrot.slane %v369_v20, %v377_v21  ;;  %v389_v27 = vrot.slane %v718_v22, %v373_v19  ;;  %v393_v30 = vrot.slane %v718_v22, %v377_v21  ;;  %s1218_s27 = scalar_lea.hbm %s1264_s3, %s732_s8  ;;  %s607_s16 = scalar_lea.sflag [#allocation4], %s1117_s30 }
  0x5c   : > { %285 = vmatpush1.bf16.msra.mxu0 %v818_v5  ;;  %241 = vmatpush1.bf16.msra.mxu1 %v818_v5  ;;  %v206_v9 = vpack.c.bf16 %v205_v8, %v205_v8  ;;  %s885_s28 = scalar_lea.vmem %s1220_s9, 256  ;;  %s968_s29 = smov [#allocation7]  }
  0x5d   : > { %326 = vmatprep.subr.bf16.mxu0 %v813_v1  ;;  %v965_v1 = vmov 2102212464   ;;  %p886_p1 = scmp.ne.s32.totalorder %s1220_s9, %s885_s28  ;;  %s889_s23 = sshll.u32 %s968_s29, 4  ;;  %s890_s23 = int_to_ptr.vmem [resolvable:$false] %s889_s23 }
  0x5e   : > { %v207_v10 = vunpack.c.l.bf16 %v206_v9  ;;  %s891_s22 = scalar_lea.vmem %s890_s23, 512  ;;  %p892_p8 = scmp.lt.s32.totalorder %s1220_s9, %s890_s23 }
  0x5f   : > { %716 = vmatmul.mubr.msk.bf16.vlgmr.msra.gmra.mrb[0].mxu0 %vm234_vm0, %v203_v6  ;;  %715 = vmatmul.mubr.msk.bf16.vlgmr.msra.gmra.mrb[0].mxu1 %vm234_vm0, %v206_v9  ;;  %p887_p4 = pnand %p886_p1, %p1072_p12  ;;  %p893_p13 = scmp.lt.s32.totalorder %s891_s22, %s885_s28 }
  0x60   : > { %327 = vmatpush1.bf16.msra.mxu0 %v815_v2  ;;  %358 = vmatprep.mubr.bf16.mxu0 %v961_v0  ;;  %v208_v11 = vsub.f32 %v205_v8, %v207_v10  ;;  %v967_v10 = vmov 1326507024  }
  0x61   : > { %328 = vmatprep.subr.bf16.mxu0 %v816_v3  ;;  %v966_v3 = vmov 920167782   ;;  %p888_p6 = pneg %p887_p4  ;;  %p894_p3 = por %p893_p13, %p892_p8 }
  0x62   : > { %v209_v12 = vpack.c.bf16 %v208_v11, %v208_v11 }
  0x63   : > { %p895_p7 = pnand %p894_p3, %p888_p6 }
  0x64   : > { %329 = vmatpush1.bf16.msra.mxu0 %v818_v5 }
  0x6b   : > { %717 = vmatmul.mubr.msk.bf16.vlgmr.msra.gmra.mrb[0].mxu0 %vm234_vm0, %v209_v12 }
 0x132   : > { %v272_v14 = vpop.f32.mrb[0].mxu1 }
 0x133   : > { %v274_v15 = vpop.f32.mrb[1].mxu1 }
 0x134   : > { %v276_v16 = vpop.f32.mrb[2].mxu1 }
 0x135   : > { %v277_v18 = vpop.f32.mrb[3].mxu1 }
 0x13e   : > { %v360_v24 = vpop.f32.mrb[0].mxu0 }
 0x13f   : > { %v733_v26 = vadd.f32 %v360_v24, %v272_v14  ;;  %v362_v28 = vpop.f32.mrb[1].mxu0 }
 0x140   : > { %v734_v29 = vadd.f32 %v362_v28, %v274_v15  ;;  %v364_v31 = vpop.f32.mrb[2].mxu0 }
 0x141   : > { %v381_v32 = vmul.f32 %v733_v26, %v374_v23  ;;  %v365_v33 = vpop.f32.mrb[3].mxu0 }
 0x142   : > { %v382_v34 = vmul.f32 %v734_v29, %v378_v25 }
 0x143   : > { %v1135_v35 = vadd.f32 %v389_v27, %v381_v32 }
 0x144   : > { %v1137_v36 = vadd.f32 %v393_v30, %v382_v34 }
 0x145   : > { %v398_v37 = vand.u32 2147483647, %v1135_v35  ;;  %v401_v38 = vand.u32 2139095040, %v1135_v35  ;;  %vm400_vm15 = vcmp.lt.s32.totalorder %v1135_v35, 0 }
 0x146   : > { %v504_v39 = vand.u32 2139095040, %v1137_v36  ;;  %v501_v42 = vand.u32 2147483647, %v1137_v36 }
 0x147   : > { %v402_v40 = vshrl.u32 %v401_v38, 23  ;;  %v405_v41 = vand.u32 8388607, %v398_v37  ;;  %vm1190_vm0 = vcmp.le.f32.partialorder %v398_v37, 0.7853982 }
 0x148   : > { %v505_v43 = vshrl.u32 %v504_v39, 23  ;;  %v1147_v48 = vand.u32 8388607, %v501_v42 }
 0x149   : > { %v719_v44 = vadd.s32 4294967169, %v402_v40  ;;  %v406_v47 = vor.u32 8388608, %v405_v41 }
 0x14a   : > { %v723_v45 = vadd.s32 4294967169, %v505_v43  ;;  %v509_v55 = vor.u32 8388608, %v1147_v48 }
 0x14b   : > { %v408_v46 = vadd.s32 1, %v719_v44  ;;  %v1149_v54 = vshll.u32 %v406_v47, 8 }
 0x14c   : > { %v511_v49 = vadd.s32 1, %v723_v45 }
 0x14d   : > { %vm409_vm1 = vcmp.gt.s32.totalorder %v408_v46, 0 }
 0x14e   : > { %v410_v50 = vsel %vm409_vm1, %v408_v46, 0  ;;  %vm512_vm2 = vcmp.gt.s32.totalorder %v511_v49, 0  ;;  %vm503_vm1 = vcmp.lt.s32.totalorder %v1137_v36, 0 }
 0x14f   : > { %v411_v51 = vshrl.u32 %v410_v50, 5  ;;  %v412_v52 = vand.u32 31, %v410_v50  ;;  %v513_v53 = vsel %vm512_vm2, %v511_v49, 0  ;;  %v549_v49 = vshll.u32 %v509_v55, 8 }
 0x150   : > { %v1152_v59 = vshrl.u32 %v513_v53, 5  ;;  %v515_v60 = vand.u32 31, %v513_v53  ;;  %vm1202_vm2 = vcmp.le.f32.partialorder %v501_v42, 0.7853982 }
 0x151   : > { %v413_v56 = vsub.s32 32, %v412_v52  ;;  %v415_v58 = vshll.u32 %v962_v57, %v412_v52  ;;  %v418_v62 = vshll.u32 %v963_v61, %v412_v52  ;;  %v421_v0 = vshll.u32 %v964_v63, %v412_v52 }
 0x152   : > { %v424_v2 = vshll.u32 %v965_v1, %v412_v52  ;;  %v427_v4 = vshll.u32 %v966_v3, %v412_v52  ;;  %vm430_vm3 = vcmp.lt.s32.totalorder %v411_v51, 1  ;;  %vm431_vm4 = vcmp.lt.s32.totalorder %v411_v51, 2 }
 0x153   : > { %v416_v5 = vshrl.u32 %v963_v61, %v413_v56  ;;  %v419_v6 = vshrl.u32 %v964_v63, %v413_v56  ;;  %v422_v7 = vshrl.u32 %v965_v1, %v413_v56  ;;  %v414_v8 = vshrl.u32 %v962_v57, %v413_v56 }
 0x154   : > { %v425_v9 = vshrl.u32 %v966_v3, %v413_v56  ;;  %v428_v11 = vshrl.u32 %v967_v10, %v413_v56  ;;  %v516_v15 = vsub.s32 32, %v515_v60  ;;  %vm432_vm5 = vcmp.lt.s32.totalorder %v411_v51, 3 }
 0x155   : > { %v417_v12 = vor.u32 %v416_v5, %v415_v58  ;;  %v420_v13 = vor.u32 %v419_v6, %v418_v62  ;;  %v423_v14 = vor.u32 %v422_v7, %v421_v0  ;;  %vm433_vm6 = vcmp.lt.s32.totalorder %v411_v51, 4 }
 0x156   : > { %v426_v16 = vor.u32 %v425_v9, %v424_v2  ;;  %v429_v17 = vor.u32 %v428_v11, %v427_v4  ;;  %v518_v25 = vshll.u32 %v962_v57, %v515_v60  ;;  %v519_v28 = vshrl.u32 %v963_v61, %v516_v15 }
 0x157   : > { %v434_v18 = vsel %vm430_vm3, %v414_v8, %v417_v12  ;;  %v435_v19 = vsel %vm433_vm6, %v423_v14, 2102212464  ;;  %v438_v20 = vsel %vm430_vm3, %v417_v12, %v420_v13  ;;  %v442_v21 = vsel %vm430_vm3, %v420_v13, %v423_v14 }
 0x158   : > { %v436_v22 = vsel %vm432_vm5, %v420_v13, %v435_v19  ;;  %v439_v23 = vsel %vm433_vm6, %v426_v16, 920167782  ;;  %v443_v24 = vsel %vm433_vm6, %v429_v17, 1326507024  ;;  %v521_v29 = vshll.u32 %v963_v61, %v515_v60 }
 0x159   : > { %v440_v26 = vsel %vm432_vm5, %v423_v14, %v439_v23  ;;  %v444_v27 = vsel %vm432_vm5, %v426_v16, %v443_v24  ;;  %v437_v30 = vsel %vm431_vm4, %v434_v18, %v436_v22  ;;  %v522_v33 = vshrl.u32 %v964_v63, %v516_v15 }
 0x15a   : > { %v441_v31 = vsel %vm431_vm4, %v438_v20, %v440_v26  ;;  %v445_v32 = vsel %vm431_vm4, %v442_v21, %v444_v27  ;;  %v520_v41 = vor.u32 %v519_v28, %v518_v25  ;;  %v524_v44 = vshll.u32 %v964_v63, %v515_v60 }
 0x15b   : > { %v1161_v34 = vmul.u32.u64.low %v1149_v54, %v445_v32  ;;  %v1162_v38 = vmul.u32.u64.high %v1149_v54, %v445_v32, %v1161_v34  ;;  %v1165_v39 = vmul.u32.u64.low %v1149_v54, %v441_v31  ;;  %v1166_v40 = vmul.u32.u64.high %v1149_v54, %v441_v31, %v1165_v39 }
 0x15c   : > { %v523_v43 = vor.u32 %v522_v33, %v521_v29  ;;  %v525_v45 = vshrl.u32 %v965_v1, %v516_v15  ;;  %v527_v46 = vshll.u32 %v965_v1, %v515_v60  ;;  %v528_v47 = vshrl.u32 %v966_v3, %v516_v15 }
 0x15d   : > { %v531_v48 = vshrl.u32 %v967_v10, %v516_v15  ;;  %v453_v50 = vmul.u32 %v1149_v54, %v437_v30  ;;  %v517_v51 = vshrl.u32 %v962_v57, %v516_v15  ;;  %v530_v53 = vshll.u32 %v966_v3, %v515_v60 }
 0x15e   : > { %v526_v52 = vor.u32 %v525_v45, %v524_v44  ;;  %vm455_vm7 = vc.u32 %v1162_v38, %v1165_v39  ;;  %v456_v56 = vadd.s32 1, %v1166_v40  ;;  %v529_v58 = vor.u32 %v528_v47, %v527_v46 }
 0x15f   : > { %vm533_vm8 = vcmp.lt.s32.totalorder %v1152_v59, 1  ;;  %v532_v61 = vor.u32 %v531_v48, %v530_v53  ;;  %vm535_vm9 = vcmp.lt.s32.totalorder %v1152_v59, 3  ;;  %vm536_vm10 = vcmp.lt.s32.totalorder %v1152_v59, 4 }
 0x160   : > { %v541_v62 = vsel %vm533_vm8, %v520_v41, %v523_v43  ;;  %v457_v55 = vsel %vm455_vm7, %v456_v56, %v1166_v40  ;;  %v538_v63 = vsel %vm536_vm10, %v526_v52, 2102212464  ;;  %v542_v54 = vsel %vm536_vm10, %v529_v58, 920167782 }
 0x161   : > { %v545_v57 = vsel %vm533_vm8, %v523_v43, %v526_v52  ;;  %v458_v0 = vadd.s32 %v457_v55, %v453_v50  ;;  %vm534_vm11 = vcmp.lt.s32.totalorder %v1152_v59, 2  ;;  %v543_v60 = vsel %vm535_vm9, %v526_v52, %v542_v54 }
 0x162   : > { %v546_v1 = vsel %vm536_vm10, %v532_v61, 1326507024  ;;  %v537_v2 = vsel %vm533_vm8, %v517_v51, %v520_v41  ;;  %v539_v3 = vsel %vm535_vm9, %v523_v43, %v538_v63  ;;  %v544_v4 = vsel %vm534_vm11, %v541_v62, %v543_v60 }
 0x163   : > { %v547_v5 = vsel %vm535_vm9, %v529_v58, %v546_v1  ;;  %v459_v6 = vadd.s32 536870912, %v458_v0  ;;  %v1176_v8 = vmul.u32.u64.low %v549_v49, %v544_v4  ;;  %v1177_v9 = vmul.u32.u64.high %v549_v49, %v544_v4, %v1176_v8 }
 0x164   : > { %v548_v7 = vsel %vm534_vm11, %v545_v57, %v547_v5  ;;  %v540_v13 = vsel %vm534_vm11, %v537_v2, %v539_v3  ;;  %v454_v29 = vadd.s32 %v1165_v39, %v1162_v38  ;;  %vm490_vm6 = vweird.f32 %v1135_v35 }
 0x165   : > { %v1179_v10 = vmul.u32.u64.low %v549_v49, %v548_v7  ;;  %v1180_v11 = vmul.u32.u64.high %v549_v49, %v548_v7, %v1179_v10  ;;  %v460_v12 = vshrl.u32 %v459_v6, 30  ;;  %v559_v15 = vadd.s32 1, %v1177_v9 }
 0x166   : > { %v556_v59 = vmul.u32 %v549_v49, %v540_v13  ;;  %vm593_vm10 = vweird.f32 %v1137_v36 }
 0x167   : > { %v461_v14 = vshll.u32 %v460_v12, 30  ;;  %vm558_vm12 = vc.u32 %v1180_v11, %v1176_v8  ;;  %v557_v50 = vadd.s32 %v1176_v8, %v1180_v11  ;;  %v484_v54 = vsub.s32 4, %v460_v12 }
 0x168   : > { %v560_v17 = vsel %vm558_vm12, %v559_v15, %v1177_v9 }
 0x169   : > { %v462_v16 = vsub.s32 %v458_v0, %v461_v14  ;;  %v561_v18 = vadd.s32 %v560_v17, %v556_v59  ;;  %v485_v2 = vsel %vm400_vm15, %v484_v54, %v460_v12 }
 0x16a   : > { %v487_v37 = vsel %vm1190_vm0, 0, %v485_v2 }
 0x16b   : > { %v464_v19 = vsub.s32 0, %v462_v16  ;;  %v562_v20 = vadd.s32 536870912, %v561_v18  ;;  %v491_v9 = vand.u32 3, %v487_v37 }
 0x16d   : > { %v720_v21 = vmin.u32 %v464_v19, %v462_v16  ;;  %v563_v22 = vshrl.u32 %v562_v20, 30  ;;  %vm496_vm3 = vcmp.eq.s32.totalorder %v491_v9, 2  ;;  %vm493_vm4 = vcmp.eq.s32.totalorder %v491_v9, 0 }
 0x16e   : > { %vm492_vm5 = vcmp.lt.s32.totalorder %v491_v9, 2 }
 0x16f   : > { %v466_v23 = vclz %v720_v21  ;;  %v564_v24 = vshll.u32 %v563_v22, 30  ;;  %v587_v7 = vsub.s32 4, %v563_v22 }
 0x171   : > { %v721_v25 = vadd.s32 4294967294, %v466_v23  ;;  %v565_v26 = vsub.s32 %v561_v18, %v564_v24  ;;  %v588_v12 = vsel %vm503_vm1, %v587_v7, %v563_v22 }
 0x172   : > { %v590_v59 = vsel %vm1202_vm2, 0, %v588_v12 }
 0x173   : > { %vm722_vm13 = vcmp.lt.s32.totalorder %v721_v25, 0  ;;  %v567_v28 = vsub.s32 0, %v565_v26  ;;  %v594_v18 = vand.u32 3, %v590_v59 }
 0x174   : > { %v469_v27 = vsel %vm722_vm13, 0, %v721_v25 }
 0x175   : > { %v470_v30 = vsub.s32 32, %v469_v27  ;;  %v474_v31 = vsub.s32 4294967266, %v469_v27  ;;  %v724_v32 = vmin.u32 %v567_v28, %v565_v26  ;;  %v471_v33 = vshll.u32 %v462_v16, %v469_v27 }
 0x176   : > { %vm599_vm7 = vcmp.eq.s32.totalorder %v594_v18, 2  ;;  %vm596_vm8 = vcmp.eq.s32.totalorder %v594_v18, 0  ;;  %vm595_vm9 = vcmp.lt.s32.totalorder %v594_v18, 2 }
 0x177   : > { %v472_v34 = vshrl.u32 %v454_v29, %v470_v30  ;;  %v475_v40 = vadd.s32 127, %v474_v31  ;;  %v569_v41 = vclz %v724_v32 }
 0x179   : > { %v473_v43 = vor.u32 %v472_v34, %v471_v33  ;;  %v476_v44 = vshll.u32 %v475_v40, 23  ;;  %v725_v45 = vadd.s32 4294967294, %v569_v41 }
 0x17b   : > { %v477_v46 = vor.u32 4788187, %v476_v44  ;;  %vm726_vm14 = vcmp.lt.s32.totalorder %v725_v45, 0  ;;  %v480_v48 = vcvt.s32.f32 %v473_v43 }
 0x17c   : > { %v572_v49 = vsel %vm726_vm14, 0, %v725_v45 }
 0x17d   : > { %v478_v47 = vand.u32 2147483647, %v477_v46  ;;  %v573_v51 = vsub.s32 32, %v572_v49  ;;  %v577_v52 = vsub.s32 4294967266, %v572_v49  ;;  %v574_v39 = vshll.u32 %v565_v26, %v572_v49 }
 0x17f   : > { %v481_v38 = vmul.f32 %v480_v48, %v478_v47  ;;  %v575_v53 = vshrl.u32 %v557_v50, %v573_v51  ;;  %v578_v56 = vadd.s32 127, %v577_v52 }
 0x181   : > { %v482_v58 = vxor.u32 2147483648, %v481_v38  ;;  %v576_v61 = vor.u32 %v575_v53, %v574_v39  ;;  %v579_v62 = vshll.u32 %v578_v56, 23 }
 0x183   : > { %v483_v63 = vsel %vm400_vm15, %v482_v58, %v481_v38  ;;  %v580_v0 = vor.u32 4788187, %v579_v62  ;;  %v583_v1 = vcvt.s32.f32 %v576_v61 }
 0x184   : > { %v486_v57 = vsel %vm1190_vm0, %v1135_v35, %v483_v63 }
 0x185   : > { %819 = vcosq.f32 %v486_v57  ;;  %v581_v60 = vand.u32 2147483647, %v580_v0 }
 0x186   : > { %821 = vsinq.f32 %v486_v57 }
 0x187   : > { %v584_v3 = vmul.f32 %v583_v1, %v581_v60 }
 0x189   : > { %v585_v4 = vxor.u32 2147483648, %v584_v3 }
 0x18b   : > { %v586_v6 = vsel %vm503_vm1, %v585_v4, %v584_v3 }
 0x18c   : > { %v589_v8 = vsel %vm1202_vm2, %v1137_v36, %v586_v6 }
 0x18d   : > { %823 = vcosq.f32 %v589_v8 }
 0x18e   : > { %825 = vsinq.f32 %v589_v8 }
 0x18f   : > { %v820_v10 = vpop.eup %819 }
 0x190   : > { %v822_v11 = vpop.eup %821  ;;  %v497_v13 = vxor.u32 2147483648, %v820_v10 }
 0x191   : > { %v494_v14 = vxor.u32 2147483648, %v822_v11 }
 0x192   : > { %v498_v42 = vsel %vm496_vm3, %v497_v13, %v822_v11 }
 0x193   : > { %v495_v15 = vsel %vm493_vm4, %v820_v10, %v494_v14 }
 0x194   : > { %v499_v16 = vsel %vm492_vm5, %v495_v15, %v498_v42 }
 0x195   : > { %v500_v17 = vsel %vm490_vm6, nan, %v499_v16 }
 0x196   : > { %604 = vst [vmem:[%s200_s5] sm:$0xff] %v500_v17 }
 0x197   : > { %v824_v19 = vpop.eup %823 }
 0x198   : > { %v826_v20 = vpop.eup %825  ;;  %v600_v21 = vxor.u32 2147483648, %v824_v19 }
 0x199   : > { %v597_v22 = vxor.u32 2147483648, %v826_v20 }
 0x19a   : > { %v601_v23 = vsel %vm599_vm7, %v600_v21, %v826_v20 }
 0x19b   : > { %v598_v24 = vsel %vm596_vm8, %v824_v19, %v597_v22 }
 0x19c   : > { %v602_v35 = vsel %vm595_vm9, %v598_v24, %v601_v23 }
 0x19d   : > { %v603_v25 = vsel %vm593_vm10, nan, %v602_v35 }
 0x19e   : > { %605 = vst [vmem:[%s200_s5 + $0x8] sm:$0xff] %v603_v25 }
 0x19f   : > { %898 = shalt.err (!%p895_p7)
}
 0x1a0   : > { %s899_s30 = scalar_lea.hbm %s1218_s27, 256  ;;  %s903_s18 = scalar_lea.hbm %s1264_s3, 1024 }
 0x1a1   : > { %p900_p9 = scmp.ne.s32.totalorder %s1218_s27, %s899_s30  ;;  %p904_p0 = scmp.lt.u32.totalorder %s1218_s27, %s1264_s3 }
 0x1a2   : > { %p905_p2 = scmp.lt.u32.totalorder %s903_s18, %s899_s30  ;;  %p907_p1 = scmp.lt.u32.totalorder %s899_s30, %s1218_s27 }
 0x1a3   : > { %p901_p11 = pnand %p900_p9, %p1072_p12 }
 0x1a4   : > { %p906_p10 = por %p905_p2, %p904_p0 }
 0x1a5   : > { %p902_p5 = pneg %p901_p11 }
 0x1a6   : > { %p908_p4 = por %p907_p1, %p906_p10 }
 0x1a8   : > { %p909_p6 = pnand %p908_p4, %p902_p5 }
 0x1aa   : > { %912 = shalt.err (!%p909_p6)
}
 0x1ab   : > { %753 = dma.vmem_to_hbm [thread:$0]  (%p1072_p12), %s1220_s9, 256, %s1218_s27, %s607_s16  }
 0x1ac PF: > { %p770_p8 = scmp.ge.s32.totalorder %s955_s15, 2  ;;  %s633_s25 = sand.u32 1, %s943_s12  }
 0x1ad   : > { %p1283_p13 = scmp.ne.s32.totalorder %s1269_s19, 0  ;;  %s634_s26 = scalar_lea.sflag [#allocation4], %s633_s25 }
 0x1af   : > { %p764_p3 = pnand %p770_p8, %p1283_p13 }
 0x1b1   : > { %938 = dma.done.wait (!%p764_p3), %s634_s26, 256  }
 0x1b2   : > { %940 = vsyncadd (!%p764_p3), %s634_s26, 4294967040  ;;  %p17_p7 = scmp.ge.s32.totalorder %s1042_s24, 6   ;;  %s1284_s12 = smov %s947_s13 }
 0x1b3   : > { %s1285_s13 = smov %s951_s14  ;;  %s1286_s14 = smov %s1068_s17 }
 0x1b4   : > { %s1287_s15 = smov %s1042_s24  ;;  %19 = sbr.rel (!%p17_p7) target bundleno = 6 (0x6), region = 82 }
 0x1bb   :  { %639 = vsyncpa [#allocation3], 1 }
 0x1bc   :  { %641 = vsyncpa [#allocation3 + $0x1], 1 }
 0x1bd   :  { %642 = vsyncpa [#allocation6], 1 }
 0x1be   :  { %643 = vsyncpa [#allocation4], 1 }
 0x1bf   :  { %645 = vsyncpa [#allocation4 + $0x1], 1 }

</bundles_post_ra>
